<compile_context>
chip_gen: v5e
topology: v5e:2x2
jax: 0.10.0
libtpu: 0.0.40
codegen_flags: <defaults>
</compile_context>

<pallas_src>
import functools
import math

import jax
import jax.numpy as jnp
from jax.experimental import pallas as pl
from jax.experimental.pallas import tpu as pltpu


def _round_up(x, m):
    return ((x + m - 1) // m) * m


def _pad2d(a, shape):
    return jnp.pad(a, ((0, shape[0] - a.shape[0]), (0, shape[1] - a.shape[1])))


def _choose_tiles(n, tm_req, tk_req):
    """Clamp requested tiles to the (128-rounded) graph size; pad N to fit."""
    n128 = _round_up(n, 128)
    tm = min(_round_up(tm_req, 128), n128)
    tk = min(_round_up(tk_req, 128), n128)
    n_pad = _round_up(n, math.lcm(tm, tk))
    # Prefer >=2 row tiles so the "parallel" row axis spans both v7x cores.
    if n_pad // tm < 2 and n_pad >= 256 and (n_pad // 2) % 128 == 0:
        tm = n_pad // 2
    return tm, tk, n_pad


def _agg_kernel(a_ref, xw_ref, b_ref, *rest, epilogue, valid_cols, tk):
    """One (row-tile i, reduction-tile k) step of  acc += A[i,k] @ XW[k].

    k == 0    : init accumulator with the broadcast bias.
    k == last : epilogue = "relu_w2"      -> o = relu(acc) @ W2   (bf16)
                epilogue = "log_softmax"  -> o = masked log_softmax(acc)
    """
    if epilogue == "relu_w2":
        w2_ref, o_ref, acc_ref = rest
    else:
        o_ref, acc_ref = rest

    k = pl.program_id(1)

    @pl.when(k == 0)
    def _():
        acc_ref[...] = jnp.broadcast_to(b_ref[...], acc_ref.shape)

    # Resident XW slab: slice the k-th (tk, c) chunk out of VMEM.
    off = pl.multiple_of(k * tk, tk)
    acc_ref[...] += jnp.dot(a_ref[...], xw_ref[pl.ds(off, tk), :],
                            preferred_element_type=jnp.float32)

    @pl.when(k == pl.num_programs(1) - 1)
    def _():
        z = acc_ref[...]
        if epilogue == "relu_w2":
            # Fused feature transform of layer 2: relu(h) @ W2 on an otherwise
            # idle MXU during the epilogue step.
            h = jnp.maximum(z, 0.0).astype(w2_ref.dtype)
            o_ref[...] = jnp.dot(h, w2_ref[...],
                                 preferred_element_type=jnp.float32
                                 ).astype(o_ref.dtype)
        else:  # numerically stable log_softmax over the valid lane columns
            col = jax.lax.broadcasted_iota(jnp.int32, z.shape, 1)
            valid = col < valid_cols
            zm = jnp.where(valid, z, -jnp.inf)
            m = jnp.max(zm, axis=-1, keepdims=True)
            s = zm - m
            lse = jnp.log(jnp.sum(jnp.where(valid, jnp.exp(s), 0.0),
                                  axis=-1, keepdims=True))
            o_ref[...] = jnp.where(valid, s - lse, 0.0).astype(o_ref.dtype)


def _gcn_aggregate(a, xw, b, w2=None, *, out_dtype, epilogue, valid_cols,
                   tm, tk, out_cols):
    """out = epilogue(A @ XW + b), rows x reduction tiled, f32 accumulation."""
    n_pad = a.shape[0]
    c_in = xw.shape[1]
    grid = (n_pad // tm, n_pad // tk)

    in_specs = [
        pl.BlockSpec((tm, tk), lambda i, k: (i, k)),        # streamed A tile
        pl.BlockSpec((n_pad, c_in), lambda i, k: (0, 0)),   # resident XW slab
        pl.BlockSpec((1, c_in), lambda i, k: (0, 0)),       # bias row (f32)
    ]
    args = [a, xw, b]
    if w2 is not None:
        in_specs.append(pl.BlockSpec(w2.shape, lambda i, k: (0, 0)))  # resident W2
        args.append(w2)

    kernel = functools.partial(_agg_kernel, epilogue=epilogue,
                               valid_cols=valid_cols, tk=tk)

    out_itemsize = jnp.dtype(out_dtype).itemsize
    flops = 2 * n_pad * n_pad * c_in
    if w2 is not None:
        flops += 2 * n_pad * w2.shape[0] * w2.shape[1]
    bytes_accessed = int(a.size * a.dtype.itemsize
                         + xw.size * xw.dtype.itemsize
                         + b.size * b.dtype.itemsize
                         + (w2.size * w2.dtype.itemsize if w2 is not None else 0)
                         + n_pad * out_cols * out_itemsize)
    transcendentals = n_pad * out_cols if epilogue == "log_softmax" else 0

    # VMEM budget: double-buffered A tiles + resident slab(s) + acc + out.
    vmem_bytes = (2 * tm * tk * a.dtype.itemsize
                  + 2 * n_pad * c_in * xw.dtype.itemsize
                  + 2 * c_in * b.dtype.itemsize
                  + (2 * w2.size * w2.dtype.itemsize if w2 is not None else 0)
                  + tm * c_in * 4
                  + 2 * tm * out_cols * out_itemsize)
    vmem_limit = int(min(max(2 * vmem_bytes, 32 << 20), 64 << 20))

    return pl.pallas_call(
        kernel,
        out_shape=jax.ShapeDtypeStruct((n_pad, out_cols), out_dtype),
        grid=grid,
        in_specs=in_specs,
        out_specs=pl.BlockSpec((tm, out_cols), lambda i, k: (i, 0)),
        scratch_shapes=[pltpu.VMEM((tm, c_in), jnp.float32)],
        compiler_params=pltpu.CompilerParams(
            dimension_semantics=("parallel", "arbitrary"),
            vmem_limit_bytes=vmem_limit),
        cost_estimate=pl.CostEstimate(flops=int(flops),
                                      transcendentals=int(transcendentals),
                                      bytes_accessed=bytes_accessed),
    )(*args)


def gnn_forward(a_norm, x, w1, b1, w2, b2, *, tm=512, tk=512):
    """log_softmax(A @ (relu(A @ (x@W1) + b1) @ W2) + b2), dense normalized A."""
    n = x.shape[0]
    hidden = w1.shape[1]
    out_dim = w2.shape[1]

    tm, tk, n_pad = _choose_tiles(n, tm, tk)
    h_pad = _round_up(hidden, 128)
    o_pad = _round_up(out_dim, 128)

    # bf16 MXU operands (cast *before* padding; f32 accumulation in-kernel).
    a_p = _pad2d(a_norm.astype(jnp.bfloat16), (n_pad, n_pad))
    x_p = _pad2d(x.astype(jnp.bfloat16), (n_pad, x.shape[1]))
    w1_p = _pad2d(w1.astype(jnp.bfloat16), (w1.shape[0], h_pad))
    b1_p = _pad2d(b1.reshape(1, -1).astype(jnp.float32), (1, h_pad))
    w2_p = _pad2d(w2.astype(jnp.bfloat16), (h_pad, o_pad))
    b2_p = _pad2d(b2.reshape(1, -1).astype(jnp.float32), (1, o_pad))

    # Tiny first feature transform hoisted to the wrapper.
    xw1 = jnp.dot(x_p, w1_p,
                  preferred_element_type=jnp.float32).astype(jnp.bfloat16)

    # Layer 1 (+ fused h @ W2 epilogue): hw = relu(A @ XW1 + b1) @ W2
    hw2 = _gcn_aggregate(a_p, xw1, b1_p, w2_p,
                         out_dtype=jnp.bfloat16, epilogue="relu_w2",
                         valid_cols=hidden, tm=tm, tk=tk, out_cols=o_pad)

    # Layer 2: out = log_softmax(A @ hw + b2)
    out = _gcn_aggregate(a_p, hw2, b2_p, None,
                         out_dtype=jnp.float32, epilogue="log_softmax",
                         valid_cols=out_dim, tm=tm, tk=tk, out_cols=o_pad)
    return out[:n, :out_dim]


def build_normalized_adjacency(edge_index, num_nodes):
    """Dense GCN-normalized adjacency with self loops: D^{-1/2}(A+I)D^{-1/2}.

    Note: duplicate edges are deduped by .at[...].set and the diagonal always
    gets +1, which can differ slightly from PyG on graphs with duplicate
    edges / pre-existing self-loops.
    """
    src, dst = edge_index[0], edge_index[1]
    a = jnp.zeros((num_nodes, num_nodes), jnp.float32)
    a = a.at[dst, src].set(1.0)          # message flows src -> dst (row = dst)
    a_hat = a + jnp.eye(num_nodes, dtype=jnp.float32)
    deg = jnp.sum(a_hat, axis=1)
    d_inv_sqrt = jnp.where(deg > 0, 1.0 / jnp.sqrt(deg), 0.0)
    return d_inv_sqrt[:, None] * a_hat * d_inv_sqrt[None, :]


if __name__ == "__main__":
    # 200 nodes (pads to 256 -> 2x1 tile grid), input_dim=16, hidden=32, out=8
    N, INPUT_DIM, HIDDEN_DIM, OUTPUT_DIM = 200, 16, 32, 8
    key = jax.random.PRNGKey(0)
    kx, ke, kw1, kb1, kw2, kb2 = jax.random.split(key, 6)

    x = jax.random.normal(kx, (N, INPUT_DIM), dtype=jnp.float32)
    E = 4 * N
    edge_index = jax.random.randint(ke, (2, E), 0, N, dtype=jnp.int32)

    def glorot(k, fan_in, fan_out):
        lim = jnp.sqrt(6.0 / (fan_in + fan_out))
        return jax.random.uniform(k, (fan_in, fan_out), jnp.float32, -lim, lim)

    w1 = glorot(kw1, INPUT_DIM, HIDDEN_DIM)
    b1 = 0.1 * jax.random.normal(kb1, (HIDDEN_DIM,), dtype=jnp.float32)
    w2 = glorot(kw2, HIDDEN_DIM, OUTPUT_DIM)
    b2 = 0.1 * jax.random.normal(kb2, (OUTPUT_DIM,), dtype=jnp.float32)

    a_norm = build_normalized_adjacency(edge_index, N)

    out = jax.block_until_ready(gnn_forward(a_norm, x, w1, b1, w2, b2))

    # Pure-JAX f32 reference (bf16 MXU operands -> loose tolerance).
    h_ref = jnp.maximum(a_norm @ (x @ w1) + b1[None, :], 0.0)
    z_ref = a_norm @ (h_ref @ w2) + b2[None, :]
    ref = jax.nn.log_softmax(z_ref, axis=1)

    assert out.shape == ref.shape, (out.shape, ref.shape)
    assert bool(jnp.all(jnp.isfinite(out))), "non-finite values in kernel output"
    max_err = float(jnp.max(jnp.abs(out - ref)))
    assert max_err < 5e-2, f"mismatch vs reference: max |diff| = {max_err}"

    print("KERNEL_OK")
</pallas_src>

<mosaic_0001>
module attributes {stable_mosaic.version = 11 : i64} {
  func.func @_agg_kernel(%arg0: i32, %arg1: i32, %arg2: memref<128x256xbf16, #tpu.memory_space<vmem>>, %arg3: memref<256x128xbf16, #tpu.memory_space<vmem>>, %arg4: memref<1x128xf32, #tpu.memory_space<vmem>>, %arg5: memref<128x128xbf16, #tpu.memory_space<vmem>>, %arg6: memref<128x128xbf16, #tpu.memory_space<vmem>>, %arg7: memref<128x128xf32, #tpu.memory_space<vmem>>) attributes {dimension_semantics = [#tpu.dimension_semantics<parallel>, #tpu.dimension_semantics<arbitrary>], iteration_bounds = array<i64: 2, 1>, scalar_prefetch = 0 : i64, scratch_operands = 1 : i64, tpu.core_type = #tpu.core_type<tc>, window_params = [{transform_indices = @transform_0, window_bounds = array<i64: 128, 256>}, {pipeline_mode = #tpu.pipeline_mode<synchronous>, transform_indices = @transform_1, window_bounds = array<i64: 256, 128>}, {pipeline_mode = #tpu.pipeline_mode<synchronous>, transform_indices = @transform_2, window_bounds = array<i64: 1, 128>}, {pipeline_mode = #tpu.pipeline_mode<synchronous>, transform_indices = @transform_3, window_bounds = array<i64: 128, 128>}, {transform_indices = @transform_4, window_bounds = array<i64: 128, 128>}]} {
    %c0_i32 = arith.constant 0 : i32
    %0 = arith.cmpi eq, %arg1, %c0_i32 : i32
    %1 = arith.extui %0 : i1 to i32
    %c0_i32_0 = arith.constant 0 : i32
    %2 = arith.cmpi ne, %1, %c0_i32_0 : i32
    scf.if %2 {
      %c0_9 = arith.constant 0 : index
      %c0_10 = arith.constant 0 : index
      %15 = vector.load %arg4[%c0_9, %c0_10] : memref<1x128xf32, #tpu.memory_space<vmem>>, vector<1x128xf32>
      %16 = vector.shape_cast %15 : vector<1x128xf32> to vector<1x128xf32>
      %17 = vector.broadcast %16 : vector<1x128xf32> to vector<128x128xf32>
      %c0_11 = arith.constant 0 : index
      %c0_12 = arith.constant 0 : index
      %18 = vector.load %arg7[%c0_11, %c0_12] : memref<128x128xf32, #tpu.memory_space<vmem>>, vector<128x128xf32>
      tpu.vector_store %arg7[%c0_11, %c0_12], %17 {strides = array<i32>} : memref<128x128xf32, #tpu.memory_space<vmem>>, vector<128x128xf32>,
    } else {
    }
    %c256_i32 = arith.constant 256 : i32
    %3 = arith.muli %arg1, %c256_i32 : i32
    %4 = tpu.assume_multiple %3, 256 : i32
    %c0 = arith.constant 0 : index
    %c0_1 = arith.constant 0 : index
    %5 = vector.load %arg7[%c0, %c0_1] : memref<128x128xf32, #tpu.memory_space<vmem>>, vector<128x128xf32>
    %c0_2 = arith.constant 0 : index
    %c0_3 = arith.constant 0 : index
    %6 = vector.load %arg2[%c0_2, %c0_3] : memref<128x256xbf16, #tpu.memory_space<vmem>>, vector<128x256xbf16>
    %7 = arith.index_cast %4 : i32 to index
    %c0_4 = arith.constant 0 : index
    %8 = vector.load %arg3[%7, %c0_4] : memref<256x128xbf16, #tpu.memory_space<vmem>>, vector<256x128xbf16>
    %cst = arith.constant dense<0.000000e+00> : vector<128x128xf32>
    %9 = tpu.matmul %6, %8, %cst {dimension_numbers = #tpu.dot_dimension_numbers<[1], [0], [0], [1], [0, 0, 1, 1], [], []>} : vector<128x256xbf16>, vector<256x128xbf16>, vector<128x128xf32> -> vector<128x128xf32>
    %10 = arith.addf %5, %9 : vector<128x128xf32>
    %c0_5 = arith.constant 0 : index
    %c0_6 = arith.constant 0 : index
    %11 = vector.load %arg7[%c0_5, %c0_6] : memref<128x128xf32, #tpu.memory_space<vmem>>, vector<128x128xf32>
    tpu.vector_store %arg7[%c0_5, %c0_6], %10 {strides = array<i32>} : memref<128x128xf32, #tpu.memory_space<vmem>>, vector<128x128xf32>,
    %c0_i32_7 = arith.constant 0 : i32
    %12 = arith.cmpi eq, %arg1, %c0_i32_7 : i32
    %13 = arith.extui %12 : i1 to i32
    %c0_i32_8 = arith.constant 0 : i32
    %14 = arith.cmpi ne, %13, %c0_i32_8 : i32
    scf.if %14 {
      %c0_9 = arith.constant 0 : index
      %c0_10 = arith.constant 0 : index
      %15 = vector.load %arg7[%c0_9, %c0_10] : memref<128x128xf32, #tpu.memory_space<vmem>>, vector<128x128xf32>
      %cst_11 = arith.constant 0.000000e+00 : f32
      %16 = vector.broadcast %cst_11 : f32 to vector<128x128xf32>
      %17 = arith.maximumf %15, %16 : vector<128x128xf32>
      %18 = arith.truncf %17 : vector<128x128xf32> to vector<128x128xbf16>
      %c0_12 = arith.constant 0 : index
      %c0_13 = arith.constant 0 : index
      %19 = vector.load %arg5[%c0_12, %c0_13] : memref<128x128xbf16, #tpu.memory_space<vmem>>, vector<128x128xbf16>
      %cst_14 = arith.constant dense<0.000000e+00> : vector<128x128xf32>
      %20 = tpu.matmul %18, %19, %cst_14 {dimension_numbers = #tpu.dot_dimension_numbers<[1], [0], [0], [1], [0, 0, 1, 1], [], []>} : vector<128x128xbf16>, vector<128x128xbf16>, vector<128x128xf32> -> vector<128x128xf32>
      %21 = arith.truncf %20 : vector<128x128xf32> to vector<128x128xbf16>
      %c0_15 = arith.constant 0 : index
      %c0_16 = arith.constant 0 : index
      %22 = vector.load %arg6[%c0_15, %c0_16] : memref<128x128xbf16, #tpu.memory_space<vmem>>, vector<128x128xbf16>
      tpu.vector_store %arg6[%c0_15, %c0_16], %21 {strides = array<i32>} : memref<128x128xbf16, #tpu.memory_space<vmem>>, vector<128x128xbf16>,
    } else {
    }
    return
  }
  func.func @transform_0(%arg0: i32, %arg1: i32) -> (i32, i32) {
    %c0_i32 = arith.constant 0 : i32
    return %arg0, %arg1 : i32, i32
  }
  func.func @transform_1(%arg0: i32, %arg1: i32) -> (i32, i32) {
    %c0_i32 = arith.constant 0 : i32
    %c0_i32_0 = arith.constant 0 : i32
    %c0_i32_1 = arith.constant 0 : i32
    return %c0_i32, %c0_i32_0 : i32, i32
  }
  func.func @transform_2(%arg0: i32, %arg1: i32) -> (i32, i32) {
    %c0_i32 = arith.constant 0 : i32
    %c0_i32_0 = arith.constant 0 : i32
    %c0_i32_1 = arith.constant 0 : i32
    return %c0_i32, %c0_i32_0 : i32, i32
  }
  func.func @transform_3(%arg0: i32, %arg1: i32) -> (i32, i32) {
    %c0_i32 = arith.constant 0 : i32
    %c0_i32_0 = arith.constant 0 : i32
    %c0_i32_1 = arith.constant 0 : i32
    return %c0_i32, %c0_i32_0 : i32, i32
  }
  func.func @transform_4(%arg0: i32, %arg1: i32) -> (i32, i32) {
    %c0_i32 = arith.constant 0 : i32
    %c0_i32_0 = arith.constant 0 : i32
    return %arg0, %c0_i32 : i32, i32
  }
}

</mosaic_0001>

<bundles_post_ra>
// kernel: tpu_custom_call.1
= control target key start
LH: loop header
LB: loop body
LE: loop exit
PB: predicated region body
PF: predicated region fallthrough
CT: control target
= control target key end

     0   :  { %s1795_s0 = inlined_call_operand.hbm [shape: bf16[256,256], index: 0, kind: input, shape index: {}]   ;;  %s1796_s1 = inlined_call_operand.hbm [shape: bf16[256,128], index: 1, kind: input, shape index: {}]   ;;  %s1797_s2 = inlined_call_operand.vmem [shape: f32[1,128], index: 2, kind: input, shape index: {}]   ;;  %s1798_s3 = inlined_call_operand.hbm [shape: bf16[128,128], index: 3, kind: input, shape index: {}]   ;;  %s1799_s4 = inlined_call_operand.hbm [shape: bf16[256,128], index: 4, kind: output, shape index: {}]  }
   0x1   :  { %1800 = sst [smem:[#allocation13_spill]] %s1796_s1 }
   0x2   :  { %1801 = sst [smem:[#allocation14_spill]] %s1798_s3 }
   0x3   :  { %9 = vsyncpa [#allocation4], 0 }
   0x4   :  { %11 = vsyncpa [#allocation4 + $0x1], 0 }
   0x5   :  { %12 = vsyncpa [#allocation7], 0 }
   0x6   :  { %13 = vsyncpa [#allocation5], 0 }
   0x7   :  { %15 = vsyncpa [#allocation5 + $0x1], 0  ;;  %s1574_s15 = smov 0   ;;  %s1576_s16 = smov 0  }
   0x8   :  { %s1578_s17 = smov 0   ;;  %s1580_s18 = smov 0  }
   0x9   :  { %s1582_s19 = smov 0   ;;  %s1584_s20 = smov 0  }
   0xa LB: > { %s979_s21 = sadd.s32 4294967295, %s1539_s20   ;;  %s980_s22 = sadd.s32 4294967294, %s1539_s20   ;;  %s1539_s20 = sphi %s1584_s20, %s21_s20   ;;  %s1535_s19 = sphi %s1582_s19, %s1815_s19   ;;  %s1531_s18 = sphi %s1580_s18, %s1814_s18   ;;  %s1527_s17 = sphi %s1578_s17, %s1813_s17   ;;  %s1523_s16 = sphi %s1576_s16, %s1812_s16   ;;  %s1519_s15 = sphi %s1574_s15, %s1811_s15  }
   0xb   : > { %p55_p0 = scmp.ne.s32.totalorder %s1523_s16, %s1519_s15  ;;  %p1608_p1 = scmp.eq.s32.totalorder %s979_s21, 0 }
   0xc   : > { %p1612_p2 = scmp.eq.s32.totalorder %s979_s21, 1  ;;  %p148_p3 = scmp.eq.s32.totalorder %s980_s22, 1 }
   0xd   : > { %p1618_p4 = por %p1608_p1, %p55_p0  ;;  %p981_p5 = scmp.ge.s32.totalorder %s1539_s20, 1 }
   0xe   : > { %p1623_p6 = por %p148_p3, %p55_p0  ;;  %p155_p7 = scmp.lt.s32.totalorder %s1539_s20, 3 }
   0xf   : > { %s1806_s1 = sld [smem:[#allocation13_spill]]  ;;  %s1541_s5 = smov [#allocation6]  }
  0x10   : > { %p1631_p8 = pnand %p981_p5, %p155_p7  ;;  %s168_s6 = sshll.u32 %s1541_s5, 4  ;;  %s169_s6 = int_to_ptr.vmem [resolvable:$true] %s168_s6 }
  0x11   : > { %p984_p11 = scmp.ge.s32.totalorder %s1539_s20, 2  ;;  %s1808_s3 = sld [smem:[#allocation14_spill]] }
  0x12   : > { %p1285_p9 = pneg %p1631_p8  ;;  %s1542_s10 = smov 64  }
  0x13   : > { %s1543_s11 = smov 4   ;;  %s1544_s12 = smov [#allocation8]  }
  0x14   : > { %p1286_p10 = pnand %p1285_p9, %p1608_p1  ;;  %s185_s13 = sshll.u32 %s1544_s12, 4  ;;  %s186_s13 = int_to_ptr.vmem [resolvable:$true] %s185_s13 }
  0x15   : > { %s166_s29 = sshll.u32 %s1806_s1, 4  ;;  %s33_s14 = sadd.s32 1, %s1535_s19  ;;  %s167_s29 = int_to_ptr.hbm [resolvable:$true] %s166_s29 }
  0x16   : > { %1288 = dma.hbm_to_vmem [thread:$0]  (!%p1286_p10), %s167_s29, 2048, %s169_s6, [#allocation7], %s1542_s10, %s1542_s10, %s1543_s11  }
  0x17   : > { %s183_s9 = sshll.u32 %s1808_s3, 4  ;;  %s42_s21 = sadd.s32 1, %s1527_s17  ;;  %s184_s9 = int_to_ptr.hbm [resolvable:$true] %s183_s9 }
  0x18   : > { %1291 = dma.hbm_to_vmem [thread:$0]  (!%p1286_p10), %s184_s9, 1024, %s186_s13, [#allocation7], %s1542_s10, %s1542_s10, %s1543_s11  }
  0x19   : > { %p35_p12 = scmp.ge.s32.totalorder %s33_s14, 2  ;;  %p49_p13 = scmp.ne.s32.totalorder %s1527_s17, %s1523_s16 }
  0x1a   : > { %p50_p0 = scmp.eq.s32.totalorder %s1539_s20, 0  ;;  %p1302_p3 = scmp.lt.s32.totalorder %s1539_s20, 2 }
  0x1b   : > { %s1817_s14 = smov (%p35_p12, %s33_s14), 0  ;;  %p1657_p7 = por %p1612_p2, %p49_p13 }
  0x1c   : > { %p1651_p5 = por %p50_p0, %p49_p13  ;;  %s37_s28 = ssub.s32 %s1535_s19, %s1817_s14 }
  0x1d   : > { %s199_s29 = sand.u32 1, %s1527_s17   ;;  %p40_p9 = scmp.eq.s32.totalorder %s37_s28, 0 }
  0x1e   : > { %s985_s5 = sshll.u32 %s199_s29, 7  ;;  %s1160_s6 = sshll.u32 %s1535_s19, 7 }
  0x1f   : > { %s1666_s7 = scalar_select %p40_p9, %s1527_s17, %s42_s21  }
  0x20   : > { %s211_s10 = scalar_lea.hbm %s1795_s0, %s1160_s6  ;;  %s203_s12 = scalar_lea.vmem [#allocation3], %s985_s5 }
  0x21   : > { %s212_s11 = sshll.u32 %s211_s10, 4  ;;  %s214_s13 = sshll.u32 %s203_s12, 4  ;;  %s213_s11 = int_to_ptr.hbm [resolvable:$true] %s212_s11  ;;  %s215_s13 = int_to_ptr.vmem [resolvable:$true] %s214_s13 }
  0x22   : > { %p1293_p2 = pnand %p1302_p3, %p1651_p5  ;;  %s200_s24 = scalar_lea.sflag [#allocation4], %s199_s29 }
  0x23   : > { %s1545_s1 = smov 128   ;;  %s1546_s3 = smov 8  }
  0x24   : > { %1295 = dma.hbm_to_vmem [thread:$0]  (!%p1293_p2), %s213_s11, 2048, %s215_s13, %s200_s24, %s1545_s1, %s1545_s1, %s1546_s3  }
  0x25   : > { %226 = sbr.rel (%p1631_p8) target bundleno = 446 (0x1be), region = 36  ;;  %s1678_s21 = sand.u32 (!%p1631_p8), 1, %s1523_s16  }
  0x26   : > { %s990_s28 = sshll.u32 (!%p1631_p8), %s1678_s21, 7  ;;  %s229_s5 = scalar_lea.sflag (!%p1631_p8), [#allocation4], %s1678_s21 }
  0x27   : > { %s1682_s6 = scalar_lea.vmem (!%p1631_p8), [#allocation3], %s990_s28 }
  0x2a   : > { %1506 = dma.done.wait (%p1618_p4), %s229_s5, 2048  }
  0x2b   : > { %1508 = vsyncadd (%p1618_p4), %s229_s5, 4294965248 }
  0x2c   : > { %1510 = dma.done.wait (%p1608_p1), [#allocation7], 3072  }
  0x2d   : > { %1512 = vsyncadd (%p1608_p1), [#allocation7], 4294964224  ;;  %v1184_v0 = vld [vmem:[#allocation6 + $0x38] sm:$0xff]  ;;  %v1183_v2 = vld [vmem:[#allocation6 + $0x30] sm:$0xff]  ;;  %s993_s23 = sshll.u32 %s1678_s21, 6  ;;  %s1201_s30 = sshll.u32 %s1531_s18, 6 }
  0x2e   : > { %v1192_v1 = vld [vmem:[#allocation6 + $0x78] sm:$0xff]  ;;  %540 = vmatpush.bf16.msra.mxu0 %v1184_v0  ;;  %1249 = vmatpush.bf16.msra.mxu3 %v1184_v0  ;;  %v1191_v3 = vld [vmem:[#allocation6 + $0x70] sm:$0xff]  ;;  %v1182_v4 = vld [vmem:[#allocation6 + $0x28] sm:$0xff]  ;;  %s1746_s25 = scalar_lea.vmem [#allocation9], %s993_s23  ;;  %s870_s8 = scalar_lea.hbm %s1799_s4, %s1201_s30 }
  0x2f   : > { %589 = vmatpush.bf16.msra.mxu1 %v1192_v1  ;;  %v1190_v5 = vld [vmem:[#allocation6 + $0x68] sm:$0xff]  ;;  %v1181_v6 = vld [vmem:[#allocation6 + $0x20] sm:$0xff]  ;;  %v1180_v8 = vld [vmem:[#allocation6 + $0x18] sm:$0xff]  ;;  %s871_s9 = sshll.u32 %s1746_s25, 4  ;;  %s873_s10 = sshll.u32 %s870_s8, 4  ;;  %s872_s9 = int_to_ptr.vmem [resolvable:$true] %s871_s9  ;;  %s874_s10 = int_to_ptr.hbm [resolvable:$true] %s873_s10 }
  0x30   : > { %v1189_v7 = vld [vmem:[#allocation6 + $0x60] sm:$0xff]  ;;  %v1188_v9 = vld [vmem:[#allocation6 + $0x58] sm:$0xff]  ;;  %v1179_v10 = vld [vmem:[#allocation6 + $0x10] sm:$0xff]  ;;  %s859_s11 = scalar_lea.sflag [#allocation5], %s1678_s21  ;;  %s1467_s12 = sshra.s32 %s874_s10, 4  ;;  %s1468_s12 = int_to_ptr.hbm [resolvable:$true] %s1467_s12 }
  0x31   : > { %v1187_v11 = vld [vmem:[#allocation6 + $0x50] sm:$0xff]  ;;  %v1178_v12 = vld [vmem:[#allocation6 + $0x8] sm:$0xff]  ;;  %v1177_v14 = vld [vmem:[#allocation6] sm:$0xff]  ;;  %s1469_s13 = scalar_lea.hbm %s1468_s12, 64  ;;  %s1473_s28 = scalar_lea.hbm %s1799_s4, 128 }
  0x32   : > { %541 = vmatpush.bf16.msra.mxu0 %v1183_v2  ;;  %1250 = vmatpush.bf16.msra.mxu3 %v1183_v2  ;;  %v1186_v13 = vld [vmem:[#allocation6 + $0x48] sm:$0xff]  ;;  %v996_v15 = vld [vmem:[%s1682_s6] sm:$0xf]  ;;  %v1161_v20 = vld [vmem:[%s1682_s6 + $0x4] sm:$0xf]  ;;  %p1470_p1 = scmp.ne.s32.totalorder %s1468_s12, %s1469_s13  ;;  %p1474_p10 = scmp.lt.s32.totalorder %s1468_s12, %s1799_s4 }
  0x33   : > { %590 = vmatpush.bf16.msra.mxu1 %v1191_v3  ;;  %v1162_v16 = vld [vmem:[%s1682_s6 + $0x4] sm:$0xf0]  ;;  %v1044_v17 = vld [vmem:[%s1682_s6 + $0x60] sm:$0xf]  ;;  %v998_v21 = vld [vmem:[%s1682_s6 + $0x8] sm:$0xf0]  ;;  %p1475_p12 = scmp.lt.s32.totalorder %s1473_s28, %s1469_s13 }
  0x34   : > { %v1174_v18 = vld [vmem:[%s1682_s6 + $0x64] sm:$0xf0]  ;;  %v1185_v19 = vld [vmem:[#allocation6 + $0x40] sm:$0xff]  ;;  %v997_v22 = vor.u32 %v1162_v16, %v996_v15  ;;  %v1001_v24 = vor.u32 %v1161_v20, %v998_v21  ;;  %v1004_v25 = vld [vmem:[%s1682_s6 + $0x10] sm:$0xf]  ;;  %p1471_p4 = pnand %p1470_p1, %p1657_p7 }
  0x35   : > { %v1045_v23 = vor.u32 %v1174_v18, %v1044_v17  ;;  %v1164_v26 = vld [vmem:[%s1682_s6 + $0x14] sm:$0xf0]  ;;  %v1052_v27 = vld [vmem:[%s1682_s6 + $0x70] sm:$0xf]  ;;  %v1163_v29 = vld [vmem:[%s1682_s6 + $0x14] sm:$0xf]  ;;  %p1476_p13 = por %p1475_p12, %p1474_p10 }
  0x36   : > { %542 = vmatpush.bf16.msra.mxu0 %v1182_v4  ;;  %1251 = vmatpush.bf16.msra.mxu3 %v1182_v4  ;;  %v1176_v28 = vld [vmem:[%s1682_s6 + $0x74] sm:$0xf0]  ;;  %v1006_v30 = vld [vmem:[%s1682_s6 + $0x18] sm:$0xf0]  ;;  %v1005_v31 = vor.u32 %v1164_v26, %v1004_v25  ;;  %v1012_v34 = vld [vmem:[%s1682_s6 + $0x20] sm:$0xf]  ;;  %p1472_p8 = pneg %p1471_p4 }
  0x37   : > { %591 = vmatpush.bf16.msra.mxu1 %v1190_v5  ;;  %v1053_v32 = vor.u32 %v1176_v28, %v1052_v27  ;;  %v1009_v33 = vor.u32 %v1163_v29, %v1006_v30  ;;  %v1166_v35 = vld [vmem:[%s1682_s6 + $0x24] sm:$0xf0]  ;;  %v1173_v36 = vld [vmem:[%s1682_s6 + $0x64] sm:$0xf]  ;;  %v1046_v37 = vld [vmem:[%s1682_s6 + $0x68] sm:$0xf0] }
  0x38   : > { %v1165_v38 = vld [vmem:[%s1682_s6 + $0x24] sm:$0xf]  ;;  %v1014_v39 = vld [vmem:[%s1682_s6 + $0x28] sm:$0xf0]  ;;  %v1013_v40 = vor.u32 %v1166_v35, %v1012_v34  ;;  %v1049_v41 = vor.u32 %v1173_v36, %v1046_v37  ;;  %v1020_v43 = vld [vmem:[%s1682_s6 + $0x30] sm:$0xf]  ;;  %p1477_p0 = pnand %p1476_p13, %p1472_p8 }
  0x39   : > { %v1017_v42 = vor.u32 %v1165_v38, %v1014_v39  ;;  %v1168_v44 = vld [vmem:[%s1682_s6 + $0x34] sm:$0xf0]  ;;  %v1175_v45 = vld [vmem:[%s1682_s6 + $0x74] sm:$0xf]  ;;  %v1054_v46 = vld [vmem:[%s1682_s6 + $0x78] sm:$0xf0] }
  0x3a   : > { %543 = vmatpush.bf16.msra.mxu0 %v1181_v6  ;;  %1252 = vmatpush.bf16.msra.mxu3 %v1181_v6  ;;  %v1167_v47 = vld [vmem:[%s1682_s6 + $0x34] sm:$0xf]  ;;  %v1022_v48 = vld [vmem:[%s1682_s6 + $0x38] sm:$0xf0]  ;;  %v1021_v49 = vor.u32 %v1168_v44, %v1020_v43  ;;  %v1057_v50 = vor.u32 %v1175_v45, %v1054_v46  ;;  %v1198_v54 = vld [vmem:[#allocation8 + $0x28] sm:$0xff] }
  0x3b   : > { %592 = vmatpush.bf16.msra.mxu1 %v1189_v7  ;;  %v1025_v51 = vor.u32 %v1167_v47, %v1022_v48  ;;  %v1200_v52 = vld [vmem:[#allocation8 + $0x38] sm:$0xff]  ;;  %v1199_v53 = vld [vmem:[#allocation8 + $0x30] sm:$0xff]  ;;  %v1028_v55 = vld [vmem:[%s1682_s6 + $0x40] sm:$0xf] }
  0x3c   : > { %777 = vmatpush.bf16.msra.mxu2 %v1200_v52  ;;  %v1170_v56 = vld [vmem:[%s1682_s6 + $0x44] sm:$0xf0]  ;;  %v1169_v57 = vld [vmem:[%s1682_s6 + $0x44] sm:$0xf]  ;;  %v1030_v58 = vld [vmem:[%s1682_s6 + $0x48] sm:$0xf0] }
  0x3d   : > { %v1197_v59 = vld [vmem:[#allocation8 + $0x20] sm:$0xff]  ;;  %v1029_v60 = vor.u32 %v1170_v56, %v1028_v55  ;;  %v1033_v61 = vor.u32 %v1169_v57, %v1030_v58  ;;  %v1036_v62 = vld [vmem:[%s1682_s6 + $0x50] sm:$0xf]  ;;  %v1172_v63 = vld [vmem:[%s1682_s6 + $0x54] sm:$0xf0] }
  0x3e   : > { %544 = vmatpush.bf16.msra.mxu0 %v1180_v8  ;;  %1253 = vmatpush.bf16.msra.mxu3 %v1180_v8  ;;  %v1171_v0 = vld [vmem:[%s1682_s6 + $0x54] sm:$0xf]  ;;  %v1037_v2 = vor.u32 %v1172_v63, %v1036_v62  ;;  %v1196_v4 = vld [vmem:[#allocation8 + $0x18] sm:$0xff]  ;;  %v1194_v6 = vld [vmem:[#allocation8 + $0x8] sm:$0xff] }
  0x3f   : > { %593 = vmatpush.bf16.msra.mxu1 %v1188_v9 }
  0x40   : > { %778 = vmatpush.bf16.msra.mxu2 %v1199_v53 }
  0x42   : > { %545 = vmatpush.bf16.msra.mxu0 %v1179_v10  ;;  %1254 = vmatpush.bf16.msra.mxu3 %v1179_v10  ;;  %v1727_v10 = vld [vmem:[%s1797_s2] ss:$0 sm:$0xff] }
  0x43   : > { %594 = vmatpush.bf16.msra.mxu1 %v1187_v11 }
  0x44   : > { %779 = vmatpush.bf16.msra.mxu2 %v1198_v54 }
  0x46   : > { %546 = vmatpush.bf16.msra.mxu0 %v1178_v12  ;;  %1255 = vmatpush.bf16.msra.mxu3 %v1178_v12 }
  0x47   : > { %595 = vmatpush.bf16.msra.mxu1 %v1186_v13 }
  0x48   : > { %780 = vmatpush.bf16.msra.mxu2 %v1197_v59 }
  0x4a   : > { %547 = vmatpush.bf16.msra.mxu0 %v1177_v14  ;;  %1256 = vmatpush.bf16.msra.mxu3 %v1177_v14 }
  0x4b   : > { %596 = vmatpush.bf16.msra.mxu1 %v1185_v19 }
  0x4c   : > { %781 = vmatpush.bf16.msra.mxu2 %v1196_v4 }
  0x4d   : > { %548 = vmatmul.bf16.vlgmr.msra.gmra.mxu0 %v997_v22  ;;  %578 = vmatmul.bf16.vlgmr.msra.gmra.mxu3 %v1045_v23 }
  0x4e   : > { %1257 = vmatpush.bf16.msrb.mxu3 %v1192_v1  ;;  %597 = vmatmul.bf16.vlgmr.msra.gmra.mxu1 %v1001_v24  ;;  %v1038_v1 = vld [vmem:[%s1682_s6 + $0x58] sm:$0xf0] }
  0x52   : > { %1258 = vmatpush.bf16.msrb.mxu3 %v1191_v3  ;;  %v1041_v3 = vor.u32 %v1171_v0, %v1038_v1 }
  0x56   : > { %1259 = vmatpush.bf16.msrb.mxu3 %v1190_v5  ;;  %v1195_v5 = vld [vmem:[#allocation8 + $0x10] sm:$0xff] }
  0x57   : > { %782 = vmatpush.bf16.msra.mxu2 %v1195_v5 }
  0x5a   : > { %1260 = vmatpush.bf16.msrb.mxu3 %v1189_v7  ;;  %v1193_v7 = vld [vmem:[#allocation8] sm:$0xff] }
  0x5b   : > { %783 = vmatpush.bf16.msra.mxu2 %v1194_v6 }
  0x5d   : > { %553 = vmatmul.bf16.gmra.mxu0 %v1005_v31  ;;  %583 = vmatmul.bf16.gmra.mxu3 %v1053_v32 }
  0x5e   : > { %1261 = vmatpush.bf16.msrb.mxu3 %v1188_v9  ;;  %602 = vmatmul.bf16.gmra.mxu1 %v1009_v33 }
  0x5f   : > { %784 = vmatpush.bf16.msra.mxu2 %v1193_v7 }
  0x62   : > { %1262 = vmatpush.bf16.msrb.mxu3 %v1187_v11 }
  0x66   : > { %1263 = vmatpush.bf16.msrb.mxu3 %v1186_v13 }
  0x6a   : > { %1264 = vmatpush.bf16.msrb.mxu3 %v1185_v19 }
  0x6d   : > { %558 = vmatmul.bf16.gmra.mxu0 %v1013_v40  ;;  %627 = vmatmul.bf16.vlgmr.msrb.gmra.mxu3 %v1049_v41 }
  0x6e   : > { %607 = vmatmul.bf16.gmra.mxu1 %v1017_v42  ;;  %1265 = vmatpush.bf16.msra.mxu3 %v1200_v52 }
  0x72   : > { %1266 = vmatpush.bf16.msra.mxu3 %v1199_v53 }
  0x76   : > { %1267 = vmatpush.bf16.msra.mxu3 %v1198_v54 }
  0x7a   : > { %1268 = vmatpush.bf16.msra.mxu3 %v1197_v59 }
  0x7d   : > { %563 = vmatmul.bf16.gmra.mxu0 %v1021_v49  ;;  %632 = vmatmul.bf16.gmra.mxu3 %v1057_v50 }
  0x7e   : > { %612 = vmatmul.bf16.gmra.mxu1 %v1025_v51  ;;  %1269 = vmatpush.bf16.msra.mxu3 %v1196_v4 }
  0x82   : > { %1270 = vmatpush.bf16.msra.mxu3 %v1195_v5 }
  0x86   : > { %1271 = vmatpush.bf16.msra.mxu3 %v1194_v6 }
  0x8a   : > { %1272 = vmatpush.bf16.msra.mxu3 %v1193_v7 }
  0x8d   : > { %568 = vmatmul.bf16.gmra.mxu0 %v1029_v60 }
  0x8e   : > { %617 = vmatmul.bf16.gmra.mxu1 %v1033_v61 }
  0x9d   : > { %573 = vmatmul.bf16.gmra.mxu0 %v1037_v2 }
  0x9e   : > { %622 = vmatmul.bf16.gmra.mxu1 %v1041_v3 }
  0xca   : > { %v549_v8 = vpop.f32.mrf.mxu0 }
  0xcb   : > { %v598_v9 = vpop.f32.mrf.mxu1 }
  0xcc   : > { %v599_v11 = vadd.f32 %v598_v9, %v549_v8 }
  0xce   : > { %v638_v15 = vadd.f32 %v1727_v10, %v599_v11 }
  0xd0   : > { %v579_v12 = vpop.f32.mrf.mxu3  ;;  %v689_v18 = vmax.f32 %v638_v15, 0.0 }
  0xd2   : > { %v551_v13 = vpop.f32.mrf.mxu0 }
  0xd3   : > { %v600_v14 = vpop.f32.mrf.mxu1 }
  0xd4   : > { %v601_v16 = vadd.f32 %v600_v14, %v551_v13 }
  0xd6   : > { %v639_v17 = vadd.f32 %v1727_v10, %v601_v16 }
  0xd8   : > { %v690_v19 = vmax.f32 %v639_v17, 0.0  ;;  %v581_v20 = vpop.f32.mrf.mxu3 }
  0xda   : > { %v554_v21 = vpop.f32.mrf.mxu0  ;;  %v705_v22 = vpack.c.bf16 %v690_v19, %v689_v18 }
  0xdb   : > { %v603_v23 = vpop.f32.mrf.mxu1 }
  0xdc   : > { %785 = vmatmul.bf16.vlgmr.msra.gmra.mxu2 %v705_v22  ;;  %v604_v24 = vadd.f32 %v603_v23, %v554_v21 }
  0xde   : > { %v640_v28 = vadd.f32 %v1727_v10, %v604_v24 }
  0xe0   : > { %v584_v25 = vpop.f32.mrf.mxu3  ;;  %v691_v31 = vmax.f32 %v640_v28, 0.0 }
  0xe2   : > { %v556_v26 = vpop.f32.mrf.mxu0 }
  0xe3   : > { %v605_v27 = vpop.f32.mrf.mxu1 }
  0xe4   : > { %v606_v29 = vadd.f32 %v605_v27, %v556_v26 }
  0xe6   : > { %v641_v30 = vadd.f32 %v1727_v10, %v606_v29 }
  0xe8   : > { %v692_v32 = vmax.f32 %v641_v30, 0.0  ;;  %v586_v33 = vpop.f32.mrf.mxu3 }
  0xea   : > { %v559_v34 = vpop.f32.mrf.mxu0  ;;  %v706_v35 = vpack.c.bf16 %v692_v32, %v691_v31 }
  0xeb   : > { %v608_v36 = vpop.f32.mrf.mxu1 }
  0xec   : > { %790 = vmatmul.bf16.gmra.mxu2 %v706_v35  ;;  %v609_v37 = vadd.f32 %v608_v36, %v559_v34 }
  0xee   : > { %v642_v41 = vadd.f32 %v1727_v10, %v609_v37 }
  0xf0   : > { %v628_v38 = vpop.f32.mrf.mxu3  ;;  %v693_v45 = vmax.f32 %v642_v41, 0.0 }
  0xf1   : > { %v629_v43 = vadd.f32 %v628_v38, %v579_v12 }
  0xf2   : > { %v561_v39 = vpop.f32.mrf.mxu0 }
  0xf3   : > { %v610_v40 = vpop.f32.mrf.mxu1  ;;  %v650_v48 = vadd.f32 %v1727_v10, %v629_v43 }
  0xf4   : > { %v611_v42 = vadd.f32 %v610_v40, %v561_v39 }
  0xf5   : > { %v701_v54 = vmax.f32 %v650_v48, 0.0 }
  0xf6   : > { %v643_v44 = vadd.f32 %v1727_v10, %v611_v42 }
  0xf8   : > { %v694_v46 = vmax.f32 %v643_v44, 0.0  ;;  %v630_v47 = vpop.f32.mrf.mxu3 }
  0xf9   : > { %v631_v49 = vadd.f32 %v630_v47, %v581_v20 }
  0xfa   : > { %v564_v50 = vpop.f32.mrf.mxu0  ;;  %v707_v51 = vpack.c.bf16 %v694_v46, %v693_v45 }
  0xfb   : > { %v651_v52 = vadd.f32 %v1727_v10, %v631_v49  ;;  %v613_v53 = vpop.f32.mrf.mxu1 }
  0xfc   : > { %795 = vmatmul.bf16.gmra.mxu2 %v707_v51  ;;  %v614_v57 = vadd.f32 %v613_v53, %v564_v50 }
  0xfd   : > { %v702_v55 = vmax.f32 %v651_v52, 0.0 }
  0xfe   : > { %v644_v61 = vadd.f32 %v1727_v10, %v614_v57 }
  0xff   : > { %v711_v56 = vpack.c.bf16 %v702_v55, %v701_v54 }
 0x100   : > { %v633_v58 = vpop.f32.mrf.mxu3  ;;  %v695_v1 = vmax.f32 %v644_v61, 0.0 }
 0x101   : > { %815 = vmatmul.bf16.vlgmr.msra.gmra.mxu3 %v711_v56  ;;  %v634_v63 = vadd.f32 %v633_v58, %v584_v25 }
 0x102   : > { %v566_v59 = vpop.f32.mrf.mxu0 }
 0x103   : > { %v615_v60 = vpop.f32.mrf.mxu1  ;;  %v652_v4 = vadd.f32 %v1727_v10, %v634_v63 }
 0x104   : > { %v616_v62 = vadd.f32 %v615_v60, %v566_v59 }
 0x105   : > { %v703_v11 = vmax.f32 %v652_v4, 0.0 }
 0x106   : > { %v645_v0 = vadd.f32 %v1727_v10, %v616_v62 }
 0x108   : > { %v696_v2 = vmax.f32 %v645_v0, 0.0  ;;  %v635_v3 = vpop.f32.mrf.mxu3 }
 0x109   : > { %v636_v5 = vadd.f32 %v635_v3, %v586_v33 }
 0x10a   : > { %v569_v6 = vpop.f32.mrf.mxu0  ;;  %v708_v7 = vpack.c.bf16 %v696_v2, %v695_v1 }
 0x10b   : > { %v653_v8 = vadd.f32 %v1727_v10, %v636_v5  ;;  %v618_v9 = vpop.f32.mrf.mxu1 }
 0x10c   : > { %800 = vmatmul.bf16.gmra.mxu2 %v708_v7  ;;  %v619_v14 = vadd.f32 %v618_v9, %v569_v6 }
 0x10d   : > { %v704_v12 = vmax.f32 %v653_v8, 0.0 }
 0x10e   : > { %v646_v17 = vadd.f32 %v1727_v10, %v619_v14 }
 0x10f   : > { %v712_v13 = vpack.c.bf16 %v704_v12, %v703_v11 }
 0x110   : > { %v697_v20 = vmax.f32 %v646_v17, 0.0 }
 0x111   : > { %820 = vmatmul.bf16.gmra.mxu3 %v712_v13 }
 0x112   : > { %v571_v15 = vpop.f32.mrf.mxu0 }
 0x113   : > { %v620_v16 = vpop.f32.mrf.mxu1 }
 0x114   : > { %v621_v18 = vadd.f32 %v620_v16, %v571_v15 }
 0x116   : > { %v647_v19 = vadd.f32 %v1727_v10, %v621_v18 }
 0x118   : > { %v698_v21 = vmax.f32 %v647_v19, 0.0 }
 0x11a   : > { %v574_v22 = vpop.f32.mrf.mxu0  ;;  %v709_v23 = vpack.c.bf16 %v698_v21, %v697_v20 }
 0x11b   : > { %v623_v24 = vpop.f32.mrf.mxu1 }
 0x11c   : > { %805 = vmatmul.bf16.gmra.mxu2 %v709_v23  ;;  %v624_v25 = vadd.f32 %v623_v24, %v574_v22 }
 0x11e   : > { %v648_v28 = vadd.f32 %v1727_v10, %v624_v25 }
 0x120   : > { %v699_v31 = vmax.f32 %v648_v28, 0.0 }
 0x122   : > { %v576_v26 = vpop.f32.mrf.mxu0 }
 0x123   : > { %v625_v27 = vpop.f32.mrf.mxu1 }
 0x124   : > { %v626_v29 = vadd.f32 %v625_v27, %v576_v26 }
 0x126   : > { %v649_v30 = vadd.f32 %v1727_v10, %v626_v29 }
 0x128   : > { %v700_v32 = vmax.f32 %v649_v30, 0.0 }
 0x12a   : > { %v710_v33 = vpack.c.bf16 %v700_v32, %v699_v31 }
 0x12c   : > { %810 = vmatmul.bf16.gmra.mxu2 %v710_v33 }
 0x15f   : > { %v786_v34 = vpop.f32.mrf.mxu2 }
 0x167   : > { %v788_v35 = vpop.f32.mrf.mxu2 }
 0x168   : > { %v1205_v36 = vpack.c.bf16 %v788_v35, %v786_v34 }
 0x16a   : > { %1206 = vst [vmem:[%s1746_s25] sm:$0xff] %v1205_v36  }
 0x16f   : > { %v791_v37 = vpop.f32.mrf.mxu2 }
 0x177   : > { %v793_v38 = vpop.f32.mrf.mxu2 }
 0x178   : > { %v1210_v39 = vpack.c.bf16 %v793_v38, %v791_v37 }
 0x17a   : > { %1242 = vst [vmem:[%s1746_s25 + $0x8] sm:$0xff] %v1210_v39  }
 0x17f   : > { %v796_v10 = vpop.f32.mrf.mxu2 }
 0x184   : > { %v816_v40 = vpop.f32.mrf.mxu3 }
 0x187   : > { %v798_v41 = vpop.f32.mrf.mxu2 }
 0x188   : > { %v1215_v42 = vpack.c.bf16 %v798_v41, %v796_v10 }
 0x18a   : > { %1243 = vst [vmem:[%s1746_s25 + $0x10] sm:$0xff] %v1215_v42  }
 0x18c   : > { %v818_v43 = vpop.f32.mrf.mxu3 }
 0x18d   : > { %v1235_v44 = vpack.c.bf16 %v818_v43, %v816_v40 }
 0x18f   : > { %1247 = vst [vmem:[%s1746_s25 + $0x30] sm:$0xff] %v1235_v44   ;;  %v801_v45 = vpop.f32.mrf.mxu2 }
 0x194   : > { %v821_v46 = vpop.f32.mrf.mxu3 }
 0x197   : > { %v803_v47 = vpop.f32.mrf.mxu2 }
 0x198   : > { %v1220_v48 = vpack.c.bf16 %v803_v47, %v801_v45 }
 0x19a   : > { %1244 = vst [vmem:[%s1746_s25 + $0x18] sm:$0xff] %v1220_v48  }
 0x19c   : > { %v823_v49 = vpop.f32.mrf.mxu3 }
 0x19d   : > { %v1240_v50 = vpack.c.bf16 %v823_v49, %v821_v46 }
 0x19f   : > { %1248 = vst [vmem:[%s1746_s25 + $0x38] sm:$0xff] %v1240_v50   ;;  %v806_v51 = vpop.f32.mrf.mxu2 }
 0x1a7   : > { %v808_v52 = vpop.f32.mrf.mxu2 }
 0x1a8   : > { %v1225_v53 = vpack.c.bf16 %v808_v52, %v806_v51 }
 0x1aa   : > { %1245 = vst [vmem:[%s1746_s25 + $0x20] sm:$0xff] %v1225_v53  }
 0x1af   : > { %v811_v54 = vpop.f32.mrf.mxu2 }
 0x1b7   : > { %v813_v55 = vpop.f32.mrf.mxu2 }
 0x1b8   : > { %v1230_v56 = vpack.c.bf16 %v813_v55, %v811_v54 }
 0x1ba   : > { %1246 = vst [vmem:[%s1746_s25 + $0x28] sm:$0xff] %v1230_v56  }
 0x1bb   : > { %1480 = shalt.err (!%p1477_p0)
}
 0x1bc   : > { %s1547_s21 = smov 64   ;;  %s1548_s1 = smov 4  }
 0x1bd   : > { %1283 = dma.vmem_to_hbm [thread:$0]  (%p1657_p7), %s872_s9, 1024, %s874_s10, %s859_s11, %s1547_s21, %s1547_s21, %s1548_s1  }
 0x1be PF: > { %s888_s3 = sand.u32 1, %s1519_s15   ;;  %p1297_p3 = pnand %p984_p11, %p1623_p6 }
 0x1bf   : > { %s889_s23 = scalar_lea.sflag [#allocation5], %s888_s3 }
 0x1c0   : > { %p1298_p5 = pneg %p1297_p3 }
 0x1c2   : > { %1514 = dma.done.wait (%p1298_p5), %s889_s23, 1024  }
 0x1c3   : > { %1516 = vsyncadd (%p1298_p5), %s889_s23, 4294966272  ;;  %s21_s20 = sadd.s32 1, %s1539_s20   ;;  %s1811_s15 = smov %s1523_s16 }
 0x1c4   : > { %p18_p9 = scmp.ge.s32.totalorder %s21_s20, 4   ;;  %s1812_s16 = smov %s1527_s17 }
 0x1c5   : > { %s1813_s17 = smov %s1666_s7  ;;  %s1814_s18 = smov %s1535_s19 }
 0x1c6   : > { %s1815_s19 = smov %s1817_s14  ;;  %20 = sbr.rel (!%p18_p9) target bundleno = 10 (0xa), region = 98 }
 0x1cb   :  { %895 = vsyncpa [#allocation4], 1 }
 0x1cc   :  { %897 = vsyncpa [#allocation4 + $0x1], 1 }
 0x1cd   :  { %898 = vsyncpa [#allocation7], 1 }
 0x1ce   :  { %899 = vsyncpa [#allocation5], 1 }
 0x1cf   :  { %901 = vsyncpa [#allocation5 + $0x1], 1 }

</bundles_post_ra>
